<compile_context>
chip_gen: v6e
topology: v6e:2x2x1
jax: 0.10.0
libtpu: 0.0.40
codegen_flags: <defaults>
</compile_context>

<pallas_src>
import functools

import jax
import jax.numpy as jnp
from jax import lax
from jax.experimental import pallas as pl
from jax.experimental.pallas import tpu as pltpu


def residual_block_kernel(x_ref, w1_ref, b1_ref, w2_ref, b2_ref, m_ref, o_ref,
                          *, shifts):
    """One grid step = one batch group folded into the lane dim.

    x_ref : (1, Cp, lanes)   input slab, channels on sublanes, pixels on lanes
    w*_ref: (Cp, 9*Cp)       conv weights flattened to (Cout, 9*Cin), tap-major K
    b*_ref: (Cp, 1)          biases (broadcast over lanes)
    m_ref : (9, Cp, lanes)   precomputed zero-padding masks per tap (f32 0/1)
    o_ref : (1, Cp, lanes)   output slab
    shifts: static tuple of 9 flat lane shifts (di*W + dj)
    """
    lanes = x_ref.shape[2]
    x = x_ref[0]                                   # (Cp, lanes) f32, lane-dense
    w1 = w1_ref[...]
    w2 = w2_ref[...]
    b1 = b1_ref[...]
    b2 = b2_ref[...]

    def conv3x3(img, w, b):
        # Build the (9*Cp, lanes) patch matrix entirely in vregs:
        # roll (XLU, ~free next to the MXU) + multiply by the precomputed
        # 0/1 mask (one VALU op, no broadcast/iota), then ONE fused matmul.
        slabs = []
        for t, s in enumerate(shifts):
            if s == 0:
                slabs.append(img)                                  # center tap
            else:
                shifted = pltpu.roll(img, shift=(-s) % lanes, axis=1)
                slabs.append(shifted * m_ref[t])                   # zero padding
        patch = jnp.concatenate(slabs, axis=0)                     # (9*Cp, lanes)
        acc = jnp.dot(w, patch, preferred_element_type=jnp.float32)
        return acc + b                                             # (Cp,1) bcast

    h1 = jnp.maximum(conv3x3(x, w1, b1), 0.0)                  # conv1 + ReLU
    out = jnp.maximum(conv3x3(h1, w2, b2) + x, 0.0)            # conv2 + res + ReLU
    o_ref[0] = out.astype(o_ref.dtype)


def residual_block(x_nchw, w1, b1, w2, b2, *, num_groups=1):
    """x_nchw: (B, C, H, W) f32. w*: (3, 3, Cin, Cout) HWIO; b*: (Cout,).

    NOTE: PyTorch-native OIHW weights must be permuted to HWIO before calling.
    num_groups: grid steps; batch is split into groups and each group's images
    are folded into the lane dim. Use 1 on single-TC v5e/v6e, 2 on v7x.
    """
    B, C, H, W = x_nchw.shape
    Cout = w1.shape[-1]
    assert Cout == C, "residual add requires in_channels == out_channels"
    assert B % num_groups == 0, "batch must divide evenly into groups"
    G = num_groups
    BG = B // G
    N = H * W
    lanes = BG * N
    Cp = ((C + 7) // 8) * 8          # pad channels to the f32 sublane tile (8)

    # --- wrapper-side plumbing: channel pad + fold batch group into lanes ----
    x_p = jnp.pad(x_nchw, ((0, 0), (0, Cp - C), (0, 0), (0, 0)))
    x2 = (x_p.reshape(G, BG, Cp, N)
              .transpose(0, 2, 1, 3)             # (G, Cp, BG, N)
              .reshape(G, Cp, lanes))

    def flat_w(w):
        # (3,3,Cin,Cout) HWIO -> zero-pad channels -> (Cp, 9*Cp), tap-major K.
        wp = jnp.zeros((3, 3, Cp, Cp), w.dtype).at[:, :, :C, :C].set(w)
        return wp.reshape(9 * Cp, Cp).T

    w1m, w2m = flat_w(w1), flat_w(w2)
    b1c = jnp.pad(b1, (0, Cp - C)).reshape(Cp, 1)
    b2c = jnp.pad(b2, (0, Cp - C)).reshape(Cp, 1)

    # --- precomputed tap shifts + seam-safe, pre-broadcast padding masks -----
    pos = jnp.arange(lanes, dtype=jnp.int32) % N   # in-image flat position
    h_idx = pos // W
    w_idx = pos % W
    shifts, mrows = [], []
    for ki in range(3):
        for kj in range(3):
            di, dj = ki - 1, kj - 1
            shifts.append(di * W + dj)
            m = jnp.ones((lanes,), jnp.float32)
            if di == 1:
                m = m * (h_idx < H - 1)
            elif di == -1:
                m = m * (h_idx >= 1)
            if dj == 1:
                m = m * (w_idx < W - 1)
            elif dj == -1:
                m = m * (w_idx >= 1)
            mrows.append(m)
    masks = jnp.broadcast_to(jnp.stack(mrows, 0)[:, None, :],
                             (9, Cp, lanes)).astype(jnp.float32)

    kern = functools.partial(residual_block_kernel, shifts=tuple(shifts))

    out = pl.pallas_call(
        kern,
        out_shape=jax.ShapeDtypeStruct((G, Cp, lanes), x_nchw.dtype),
        grid_spec=pltpu.PrefetchScalarGridSpec(
            num_scalar_prefetch=0,
            grid=(G,),
            in_specs=[
                pl.BlockSpec((1, Cp, lanes), lambda g: (g, 0, 0)),   # x slab
                pl.BlockSpec((Cp, 9 * Cp), lambda g: (0, 0)),        # w1 flat
                pl.BlockSpec((Cp, 1), lambda g: (0, 0)),             # b1
                pl.BlockSpec((Cp, 9 * Cp), lambda g: (0, 0)),        # w2 flat
                pl.BlockSpec((Cp, 1), lambda g: (0, 0)),             # b2
                pl.BlockSpec((9, Cp, lanes), lambda g: (0, 0, 0)),   # masks
            ],
            out_specs=pl.BlockSpec((1, Cp, lanes), lambda g: (g, 0, 0)),
        ),
        compiler_params=pltpu.CompilerParams(
            dimension_semantics=("parallel",)),   # splits groups across v7x TCs
    )(x2, w1m, b1c, w2m, b2c, masks)

    # Un-fold lanes back to (B, C, H, W) and drop the channel padding.
    out = (out.reshape(G, Cp, BG, H, W)
              .transpose(0, 2, 1, 3, 4)
              .reshape(B, Cp, H, W))
    return out[:, :C]


def residual_block_ref(x_nchw, w1, b1, w2, b2):
    """Pure-JAX reference matching the PyTorch module semantics."""
    x = jnp.transpose(x_nchw, (0, 2, 3, 1))
    dn = ("NHWC", "HWIO", "NHWC")
    h = lax.conv_general_dilated(x, w1, (1, 1), "SAME", dimension_numbers=dn)
    h = jax.nn.relu(h + b1[None, None, None, :])
    h = lax.conv_general_dilated(h, w2, (1, 1), "SAME", dimension_numbers=dn)
    out = jax.nn.relu(h + b2[None, None, None, :] + x)
    return jnp.transpose(out, (0, 3, 1, 2))


if __name__ == "__main__":
    B, C, H, W = 2, 4, 16, 16   # ResidualBlock(in_channels=4, out_channels=4)
    key = jax.random.PRNGKey(0)
    kx, k1, k2, k3, k4 = jax.random.split(key, 5)

    x = jax.random.normal(kx, (B, C, H, W), dtype=jnp.float32)
    # Synthetic parameters, shapes per nn.Conv2d(C, C, 3, 1, 1), stored HWIO.
    w1 = jax.random.normal(k1, (3, 3, C, C), dtype=jnp.float32) * 0.1
    b1 = jax.random.normal(k2, (C,), dtype=jnp.float32) * 0.1
    w2 = jax.random.normal(k3, (3, 3, C, C), dtype=jnp.float32) * 0.1
    b2 = jax.random.normal(k4, (C,), dtype=jnp.float32) * 0.1

    out = jax.block_until_ready(residual_block(x, w1, b1, w2, b2))
    ref = jax.block_until_ready(residual_block_ref(x, w1, b1, w2, b2))

    assert out.shape == (B, C, H, W)
    assert jnp.allclose(out, ref, atol=1e-4, rtol=1e-4), "mismatch vs reference"
    print("KERNEL_OK")
</pallas_src>

<mosaic_0001>
module attributes {stable_mosaic.version = 11 : i64} {
  func.func @residual_block_kernel(%arg0: i32, %arg1: memref<1x8x512xf32, #tpu.memory_space<vmem>>, %arg2: memref<8x72xf32, #tpu.memory_space<vmem>>, %arg3: memref<8x1xf32, #tpu.memory_space<vmem>>, %arg4: memref<8x72xf32, #tpu.memory_space<vmem>>, %arg5: memref<8x1xf32, #tpu.memory_space<vmem>>, %arg6: memref<9x8x512xf32, #tpu.memory_space<vmem>>, %arg7: memref<1x8x512xf32, #tpu.memory_space<vmem>>) attributes {dimension_semantics = [#tpu.dimension_semantics<parallel>], iteration_bounds = array<i64: 1>, scalar_prefetch = 0 : i64, scratch_operands = 0 : i64, tpu.core_type = #tpu.core_type<tc>, window_params = [{transform_indices = @transform_0, window_bounds = array<i64: 1, 8, 512>}, {pipeline_mode = #tpu.pipeline_mode<synchronous>, transform_indices = @transform_1, window_bounds = array<i64: 8, 72>}, {pipeline_mode = #tpu.pipeline_mode<synchronous>, transform_indices = @transform_2, window_bounds = array<i64: 8, 1>}, {pipeline_mode = #tpu.pipeline_mode<synchronous>, transform_indices = @transform_3, window_bounds = array<i64: 8, 72>}, {pipeline_mode = #tpu.pipeline_mode<synchronous>, transform_indices = @transform_4, window_bounds = array<i64: 8, 1>}, {pipeline_mode = #tpu.pipeline_mode<synchronous>, transform_indices = @transform_5, window_bounds = array<i64: 9, 8, 512>}, {transform_indices = @transform_6, window_bounds = array<i64: 1, 8, 512>}]} {
    %c0 = arith.constant 0 : index
    %c0_0 = arith.constant 0 : index
    %c0_1 = arith.constant 0 : index
    %0 = vector.load %arg1[%c0, %c0_0, %c0_1] : memref<1x8x512xf32, #tpu.memory_space<vmem>>, vector<1x8x512xf32>
    %1 = vector.shape_cast %0 : vector<1x8x512xf32> to vector<8x512xf32>
    %c0_2 = arith.constant 0 : index
    %c0_3 = arith.constant 0 : index
    %2 = vector.load %arg2[%c0_2, %c0_3] : memref<8x72xf32, #tpu.memory_space<vmem>>, vector<8x72xf32>
    %c0_4 = arith.constant 0 : index
    %c0_5 = arith.constant 0 : index
    %3 = vector.load %arg4[%c0_4, %c0_5] : memref<8x72xf32, #tpu.memory_space<vmem>>, vector<8x72xf32>
    %c0_6 = arith.constant 0 : index
    %c0_7 = arith.constant 0 : index
    %4 = vector.load %arg3[%c0_6, %c0_7] : memref<8x1xf32, #tpu.memory_space<vmem>>, vector<8x1xf32>
    %c0_8 = arith.constant 0 : index
    %c0_9 = arith.constant 0 : index
    %5 = vector.load %arg5[%c0_8, %c0_9] : memref<8x1xf32, #tpu.memory_space<vmem>>, vector<8x1xf32>
    %c17_i32 = arith.constant 17 : i32
    %6 = tpu.dynamic_rotate %1 by %c17_i32 dim 1 : vector<8x512xf32>, i32 -> vector<8x512xf32>
    %c0_10 = arith.constant 0 : index
    %c0_11 = arith.constant 0 : index
    %c0_12 = arith.constant 0 : index
    %7 = vector.load %arg6[%c0_10, %c0_11, %c0_12] : memref<9x8x512xf32, #tpu.memory_space<vmem>>, vector<1x8x512xf32>
    %8 = vector.shape_cast %7 : vector<1x8x512xf32> to vector<8x512xf32>
    %9 = arith.mulf %6, %8 : vector<8x512xf32>
    %c16_i32 = arith.constant 16 : i32
    %10 = tpu.dynamic_rotate %1 by %c16_i32 dim 1 : vector<8x512xf32>, i32 -> vector<8x512xf32>
    %c1 = arith.constant 1 : index
    %c0_13 = arith.constant 0 : index
    %c0_14 = arith.constant 0 : index
    %11 = vector.load %arg6[%c1, %c0_13, %c0_14] : memref<9x8x512xf32, #tpu.memory_space<vmem>>, vector<1x8x512xf32>
    %12 = vector.shape_cast %11 : vector<1x8x512xf32> to vector<8x512xf32>
    %13 = arith.mulf %10, %12 : vector<8x512xf32>
    %c15_i32 = arith.constant 15 : i32
    %14 = tpu.dynamic_rotate %1 by %c15_i32 dim 1 : vector<8x512xf32>, i32 -> vector<8x512xf32>
    %c2 = arith.constant 2 : index
    %c0_15 = arith.constant 0 : index
    %c0_16 = arith.constant 0 : index
    %15 = vector.load %arg6[%c2, %c0_15, %c0_16] : memref<9x8x512xf32, #tpu.memory_space<vmem>>, vector<1x8x512xf32>
    %16 = vector.shape_cast %15 : vector<1x8x512xf32> to vector<8x512xf32>
    %17 = arith.mulf %14, %16 : vector<8x512xf32>
    %c1_i32 = arith.constant 1 : i32
    %18 = tpu.dynamic_rotate %1 by %c1_i32 dim 1 : vector<8x512xf32>, i32 -> vector<8x512xf32>
    %c3 = arith.constant 3 : index
    %c0_17 = arith.constant 0 : index
    %c0_18 = arith.constant 0 : index
    %19 = vector.load %arg6[%c3, %c0_17, %c0_18] : memref<9x8x512xf32, #tpu.memory_space<vmem>>, vector<1x8x512xf32>
    %20 = vector.shape_cast %19 : vector<1x8x512xf32> to vector<8x512xf32>
    %21 = arith.mulf %18, %20 : vector<8x512xf32>
    %c511_i32 = arith.constant 511 : i32
    %22 = tpu.dynamic_rotate %1 by %c511_i32 dim 1 : vector<8x512xf32>, i32 -> vector<8x512xf32>
    %c5 = arith.constant 5 : index
    %c0_19 = arith.constant 0 : index
    %c0_20 = arith.constant 0 : index
    %23 = vector.load %arg6[%c5, %c0_19, %c0_20] : memref<9x8x512xf32, #tpu.memory_space<vmem>>, vector<1x8x512xf32>
    %24 = vector.shape_cast %23 : vector<1x8x512xf32> to vector<8x512xf32>
    %25 = arith.mulf %22, %24 : vector<8x512xf32>
    %c497_i32 = arith.constant 497 : i32
    %26 = tpu.dynamic_rotate %1 by %c497_i32 dim 1 : vector<8x512xf32>, i32 -> vector<8x512xf32>
    %c6 = arith.constant 6 : index
    %c0_21 = arith.constant 0 : index
    %c0_22 = arith.constant 0 : index
    %27 = vector.load %arg6[%c6, %c0_21, %c0_22] : memref<9x8x512xf32, #tpu.memory_space<vmem>>, vector<1x8x512xf32>
    %28 = vector.shape_cast %27 : vector<1x8x512xf32> to vector<8x512xf32>
    %29 = arith.mulf %26, %28 : vector<8x512xf32>
    %c496_i32 = arith.constant 496 : i32
    %30 = tpu.dynamic_rotate %1 by %c496_i32 dim 1 : vector<8x512xf32>, i32 -> vector<8x512xf32>
    %c7 = arith.constant 7 : index
    %c0_23 = arith.constant 0 : index
    %c0_24 = arith.constant 0 : index
    %31 = vector.load %arg6[%c7, %c0_23, %c0_24] : memref<9x8x512xf32, #tpu.memory_space<vmem>>, vector<1x8x512xf32>
    %32 = vector.shape_cast %31 : vector<1x8x512xf32> to vector<8x512xf32>
    %33 = arith.mulf %30, %32 : vector<8x512xf32>
    %c495_i32 = arith.constant 495 : i32
    %34 = tpu.dynamic_rotate %1 by %c495_i32 dim 1 : vector<8x512xf32>, i32 -> vector<8x512xf32>
    %c8 = arith.constant 8 : index
    %c0_25 = arith.constant 0 : index
    %c0_26 = arith.constant 0 : index
    %35 = vector.load %arg6[%c8, %c0_25, %c0_26] : memref<9x8x512xf32, #tpu.memory_space<vmem>>, vector<1x8x512xf32>
    %36 = vector.shape_cast %35 : vector<1x8x512xf32> to vector<8x512xf32>
    %37 = arith.mulf %34, %36 : vector<8x512xf32>
    %38 = tpu.concatenate %9, %13, %17, %21, %1, %25, %29, %33, %37 in 0 : vector<8x512xf32>, vector<8x512xf32>, vector<8x512xf32>, vector<8x512xf32>, vector<8x512xf32>, vector<8x512xf32>, vector<8x512xf32>, vector<8x512xf32>, vector<8x512xf32> -> vector<72x512xf32>
    %cst = arith.constant dense<0.000000e+00> : vector<8x512xf32>
    %39 = tpu.matmul %2, %38, %cst {dimension_numbers = #tpu.dot_dimension_numbers<[1], [0], [0], [1], [0, 0, 1, 1], [], []>} : vector<8x72xf32>, vector<72x512xf32>, vector<8x512xf32> -> vector<8x512xf32>
    %40 = vector.broadcast %4 : vector<8x1xf32> to vector<8x512xf32>
    %41 = arith.addf %39, %40 : vector<8x512xf32>
    %cst_27 = arith.constant 0.000000e+00 : f32
    %42 = vector.broadcast %cst_27 : f32 to vector<8x512xf32>
    %43 = arith.maximumf %41, %42 : vector<8x512xf32>
    %c17_i32_28 = arith.constant 17 : i32
    %44 = tpu.dynamic_rotate %43 by %c17_i32_28 dim 1 : vector<8x512xf32>, i32 -> vector<8x512xf32>
    %c0_29 = arith.constant 0 : index
    %c0_30 = arith.constant 0 : index
    %c0_31 = arith.constant 0 : index
    %45 = vector.load %arg6[%c0_29, %c0_30, %c0_31] : memref<9x8x512xf32, #tpu.memory_space<vmem>>, vector<1x8x512xf32>
    %46 = vector.shape_cast %45 : vector<1x8x512xf32> to vector<8x512xf32>
    %47 = arith.mulf %44, %46 : vector<8x512xf32>
    %c16_i32_32 = arith.constant 16 : i32
    %48 = tpu.dynamic_rotate %43 by %c16_i32_32 dim 1 : vector<8x512xf32>, i32 -> vector<8x512xf32>
    %c1_33 = arith.constant 1 : index
    %c0_34 = arith.constant 0 : index
    %c0_35 = arith.constant 0 : index
    %49 = vector.load %arg6[%c1_33, %c0_34, %c0_35] : memref<9x8x512xf32, #tpu.memory_space<vmem>>, vector<1x8x512xf32>
    %50 = vector.shape_cast %49 : vector<1x8x512xf32> to vector<8x512xf32>
    %51 = arith.mulf %48, %50 : vector<8x512xf32>
    %c15_i32_36 = arith.constant 15 : i32
    %52 = tpu.dynamic_rotate %43 by %c15_i32_36 dim 1 : vector<8x512xf32>, i32 -> vector<8x512xf32>
    %c2_37 = arith.constant 2 : index
    %c0_38 = arith.constant 0 : index
    %c0_39 = arith.constant 0 : index
    %53 = vector.load %arg6[%c2_37, %c0_38, %c0_39] : memref<9x8x512xf32, #tpu.memory_space<vmem>>, vector<1x8x512xf32>
    %54 = vector.shape_cast %53 : vector<1x8x512xf32> to vector<8x512xf32>
    %55 = arith.mulf %52, %54 : vector<8x512xf32>
    %c1_i32_40 = arith.constant 1 : i32
    %56 = tpu.dynamic_rotate %43 by %c1_i32_40 dim 1 : vector<8x512xf32>, i32 -> vector<8x512xf32>
    %c3_41 = arith.constant 3 : index
    %c0_42 = arith.constant 0 : index
    %c0_43 = arith.constant 0 : index
    %57 = vector.load %arg6[%c3_41, %c0_42, %c0_43] : memref<9x8x512xf32, #tpu.memory_space<vmem>>, vector<1x8x512xf32>
    %58 = vector.shape_cast %57 : vector<1x8x512xf32> to vector<8x512xf32>
    %59 = arith.mulf %56, %58 : vector<8x512xf32>
    %c511_i32_44 = arith.constant 511 : i32
    %60 = tpu.dynamic_rotate %43 by %c511_i32_44 dim 1 : vector<8x512xf32>, i32 -> vector<8x512xf32>
    %c5_45 = arith.constant 5 : index
    %c0_46 = arith.constant 0 : index
    %c0_47 = arith.constant 0 : index
    %61 = vector.load %arg6[%c5_45, %c0_46, %c0_47] : memref<9x8x512xf32, #tpu.memory_space<vmem>>, vector<1x8x512xf32>
    %62 = vector.shape_cast %61 : vector<1x8x512xf32> to vector<8x512xf32>
    %63 = arith.mulf %60, %62 : vector<8x512xf32>
    %c497_i32_48 = arith.constant 497 : i32
    %64 = tpu.dynamic_rotate %43 by %c497_i32_48 dim 1 : vector<8x512xf32>, i32 -> vector<8x512xf32>
    %c6_49 = arith.constant 6 : index
    %c0_50 = arith.constant 0 : index
    %c0_51 = arith.constant 0 : index
    %65 = vector.load %arg6[%c6_49, %c0_50, %c0_51] : memref<9x8x512xf32, #tpu.memory_space<vmem>>, vector<1x8x512xf32>
    %66 = vector.shape_cast %65 : vector<1x8x512xf32> to vector<8x512xf32>
    %67 = arith.mulf %64, %66 : vector<8x512xf32>
    %c496_i32_52 = arith.constant 496 : i32
    %68 = tpu.dynamic_rotate %43 by %c496_i32_52 dim 1 : vector<8x512xf32>, i32 -> vector<8x512xf32>
    %c7_53 = arith.constant 7 : index
    %c0_54 = arith.constant 0 : index
    %c0_55 = arith.constant 0 : index
    %69 = vector.load %arg6[%c7_53, %c0_54, %c0_55] : memref<9x8x512xf32, #tpu.memory_space<vmem>>, vector<1x8x512xf32>
    %70 = vector.shape_cast %69 : vector<1x8x512xf32> to vector<8x512xf32>
    %71 = arith.mulf %68, %70 : vector<8x512xf32>
    %c495_i32_56 = arith.constant 495 : i32
    %72 = tpu.dynamic_rotate %43 by %c495_i32_56 dim 1 : vector<8x512xf32>, i32 -> vector<8x512xf32>
    %c8_57 = arith.constant 8 : index
    %c0_58 = arith.constant 0 : index
    %c0_59 = arith.constant 0 : index
    %73 = vector.load %arg6[%c8_57, %c0_58, %c0_59] : memref<9x8x512xf32, #tpu.memory_space<vmem>>, vector<1x8x512xf32>
    %74 = vector.shape_cast %73 : vector<1x8x512xf32> to vector<8x512xf32>
    %75 = arith.mulf %72, %74 : vector<8x512xf32>
    %76 = tpu.concatenate %47, %51, %55, %59, %43, %63, %67, %71, %75 in 0 : vector<8x512xf32>, vector<8x512xf32>, vector<8x512xf32>, vector<8x512xf32>, vector<8x512xf32>, vector<8x512xf32>, vector<8x512xf32>, vector<8x512xf32>, vector<8x512xf32> -> vector<72x512xf32>
    %cst_60 = arith.constant dense<0.000000e+00> : vector<8x512xf32>
    %77 = tpu.matmul %3, %76, %cst_60 {dimension_numbers = #tpu.dot_dimension_numbers<[1], [0], [0], [1], [0, 0, 1, 1], [], []>} : vector<8x72xf32>, vector<72x512xf32>, vector<8x512xf32> -> vector<8x512xf32>
    %78 = vector.broadcast %5 : vector<8x1xf32> to vector<8x512xf32>
    %79 = arith.addf %77, %78 : vector<8x512xf32>
    %80 = arith.addf %79, %1 : vector<8x512xf32>
    %cst_61 = arith.constant 0.000000e+00 : f32
    %81 = vector.broadcast %cst_61 : f32 to vector<8x512xf32>
    %82 = arith.maximumf %80, %81 : vector<8x512xf32>
    %c0_62 = arith.constant 0 : index
    %c0_63 = arith.constant 0 : index
    %c0_64 = arith.constant 0 : index
    %83 = vector.load %arg7[%c0_62, %c0_63, %c0_64] : memref<1x8x512xf32, #tpu.memory_space<vmem>>, vector<1x8x512xf32>
    %84 = vector.shape_cast %83 : vector<1x8x512xf32> to vector<8x512xf32>
    %85 = vector.shape_cast %82 : vector<8x512xf32> to vector<1x8x512xf32>
    tpu.vector_store %arg7[%c0_62, %c0_63, %c0_64], %85 {strides = array<i32>} : memref<1x8x512xf32, #tpu.memory_space<vmem>>, vector<1x8x512xf32>,
    return
  }
  func.func @transform_0(%arg0: i32) -> (i32, i32, i32) {
    %c0_i32 = arith.constant 0 : i32
    %c0_i32_0 = arith.constant 0 : i32
    %c0_i32_1 = arith.constant 0 : i32
    return %arg0, %c0_i32, %c0_i32_0 : i32, i32, i32
  }
  func.func @transform_1(%arg0: i32) -> (i32, i32) {
    %c0_i32 = arith.constant 0 : i32
    %c0_i32_0 = arith.constant 0 : i32
    %c0_i32_1 = arith.constant 0 : i32
    return %c0_i32, %c0_i32_0 : i32, i32
  }
  func.func @transform_2(%arg0: i32) -> (i32, i32) {
    %c0_i32 = arith.constant 0 : i32
    %c0_i32_0 = arith.constant 0 : i32
    %c0_i32_1 = arith.constant 0 : i32
    return %c0_i32, %c0_i32_0 : i32, i32
  }
  func.func @transform_3(%arg0: i32) -> (i32, i32) {
    %c0_i32 = arith.constant 0 : i32
    %c0_i32_0 = arith.constant 0 : i32
    %c0_i32_1 = arith.constant 0 : i32
    return %c0_i32, %c0_i32_0 : i32, i32
  }
  func.func @transform_4(%arg0: i32) -> (i32, i32) {
    %c0_i32 = arith.constant 0 : i32
    %c0_i32_0 = arith.constant 0 : i32
    %c0_i32_1 = arith.constant 0 : i32
    return %c0_i32, %c0_i32_0 : i32, i32
  }
  func.func @transform_5(%arg0: i32) -> (i32, i32, i32) {
    %c0_i32 = arith.constant 0 : i32
    %c0_i32_0 = arith.constant 0 : i32
    %c0_i32_1 = arith.constant 0 : i32
    %c0_i32_2 = arith.constant 0 : i32
    return %c0_i32, %c0_i32_0, %c0_i32_1 : i32, i32, i32
  }
  func.func @transform_6(%arg0: i32) -> (i32, i32, i32) {
    %c0_i32 = arith.constant 0 : i32
    %c0_i32_0 = arith.constant 0 : i32
    %c0_i32_1 = arith.constant 0 : i32
    return %arg0, %c0_i32, %c0_i32_0 : i32, i32, i32
  }
}

</mosaic_0001>

<bundles_post_ra>
// kernel: tpu_custom_call.1
= control target key start
LH: loop header
LB: loop body
LE: loop exit
PB: predicated region body
PF: predicated region fallthrough
CT: control target
= control target key end

     0   :  { %11 = vsyncpa [#allocation3], 0  ;;  %s1283_s0 = inlined_call_operand.hbm [shape: f32[1,8,512], index: 0, kind: input, shape index: {}]   ;;  %s1284_s1 = inlined_call_operand.vmem [shape: f32[8,72], index: 1, kind: input, shape index: {}]   ;;  %s1285_s2 = inlined_call_operand.vmem [shape: f32[8,1], index: 2, kind: input, shape index: {}]   ;;  %s1286_s3 = inlined_call_operand.vmem [shape: f32[8,72], index: 3, kind: input, shape index: {}]   ;;  %s1287_s4 = inlined_call_operand.vmem [shape: f32[8,1], index: 4, kind: input, shape index: {}]   ;;  %s1288_s5 = inlined_call_operand.hbm [shape: f32[9,8,512], index: 5, kind: input, shape index: {}]   ;;  %s1289_s6 = inlined_call_operand.hbm [shape: f32[1,8,512], index: 6, kind: output, shape index: {}]  }
   0x1   :  { %12 = vsyncpa [#allocation6], 0 }
   0x2   :  { %13 = vsyncpa [#allocation4], 0  ;;  %s782_s21 = smov [#allocation2]   ;;  %s783_s23 = smov [#allocation5]  }
   0x3   :  { %s20_s22 = sshll.u32 %s782_s21, 4  ;;  %s37_s24 = sshll.u32 %s783_s23, 4  ;;  %s21_s22 = int_to_ptr.vmem [resolvable:$true] %s20_s22  ;;  %s38_s24 = int_to_ptr.vmem [resolvable:$true] %s37_s24 }
   0x4   :  { %s724_s25 = scalar_lea.vmem %s21_s22, 512  ;;  %p729_p1 = scmp.lt.s32.totalorder %s21_s22, %s21_s22 }
   0x5   :  { %p725_p0 = scmp.ne.s32.totalorder %s21_s22, %s724_s25  ;;  %p730_p2 = scmp.lt.s32.totalorder %s724_s25, %s724_s25 }
   0x7   :  { %p731_p3 = por %p730_p2, %p729_p1 }
   0x9   :  { %p732_p4 = pnand %p731_p3, %p725_p0 }
   0xb   :  { %735 = shalt.err (!%p732_p4)
}
   0xc   :  { %23 = dma.hbm_to_vmem [thread:$0]  %s1283_s0, 512, %s21_s22, [#allocation3]  }
   0xd   :  { %s744_s28 = scalar_lea.vmem %s38_s24, 4608  ;;  %p749_p6 = scmp.lt.s32.totalorder %s38_s24, %s38_s24 }
   0xe   :  { %p745_p5 = scmp.ne.s32.totalorder %s38_s24, %s744_s28  ;;  %p750_p7 = scmp.lt.s32.totalorder %s744_s28, %s744_s28 }
  0x10   :  { %p751_p8 = por %p750_p7, %p749_p6 }
  0x12   :  { %p752_p9 = pnand %p751_p8, %p745_p5 }
  0x14   :  { %755 = shalt.err (!%p752_p9)
}
  0x15   :  { %s784_s29 = smov 512   ;;  %s785_s30 = smov 32  }
  0x16   :  { %43 = dma.hbm_to_vmem [thread:$0]  %s1288_s5, 4608, %s38_s24, [#allocation6], %s784_s29, %s784_s29, %s785_s30  }
  0x17   :  { %776 = dma.done.wait [#allocation3], 512  }
  0x18   :  { %777 = vsyncadd [#allocation3], 4294966784 }
  0x19   :  { %778 = dma.done.wait [#allocation6], 4608  }
  0x1a   :  { %779 = vsyncadd [#allocation6], 4294962688  ;;  %v838_v0 = vld [vmem:[#allocation2 + $0x10] sm:$0xff]  ;;  %v840_v1 = vld [vmem:[#allocation2] sm:$0xff]  ;;  %s786_s0 = smov 111   ;;  %s787_s5 = smov 112   ;;  %v66_v7 = vlaneseq }
  0x1b   :  { %217 = vrot.lane.b32.xlu1 %v838_v0, %s786_s0  ;;  %213 = vrot.lane.b32.xlu0 %v840_v1, %s786_s0  ;;  %v846_v2 = vld [vmem:[#allocation2 + $0x18] sm:$0xff]  ;;  %v848_v3 = vld [vmem:[#allocation2 + $0x8] sm:$0xff]  ;;  %s788_s9 = smov 113   ;;  %s789_s10 = smov 127   ;;  %v793_v4 = vmov 0.0   ;;  %v794_v5 = vmov 0  }
  0x1c   :  { %s790_s11 = smov 1   ;;  %s791_s12 = smov 15   ;;  %308 = vmatprep.mubr.f32.mxu0 %v793_v4  ;;  %379 = vmatprep.mubr.f32.mxu1 %v793_v4  ;;  %v56_v6 = vld [vmem:[%s1285_s2] sm:$0xff]  ;;  %v915_v8 = vand.u32 127, %v66_v7  ;;  %v918_v11 = vld [vmem:[#allocation5 + $0x108] sm:$0xff]  ;;  %v920_v12 = vld [vmem:[#allocation5 + $0x118] sm:$0xff] }
  0x1d   :  { %s792_s13 = smov 16   ;;  %715 = vset.pattern.permute.xlu0 %v794_v5  ;;  %s795_s14 = smov 17   ;;  %v922_v13 = vld [vmem:[#allocation5 + $0x100] sm:$0xff]  ;;  %v924_v14 = vld [vmem:[#allocation5 + $0x110] sm:$0xff]  ;;  %v939_v27 = vld [vmem:[#allocation5 + $0xf8] sm:$0xff]  ;;  %vm240_vm8 = vcmask 588800  }
  0x1e   :  { %vm221_vm0 = vcmp.lt.s32.totalorder %v915_v8, 111  ;;  %vm199_vm1 = vcmp.lt.s32.totalorder %v915_v8, 112  ;;  %v941_v28 = vld [vmem:[#allocation5 + $0xe8] sm:$0xff]  ;;  %v943_v29 = vld [vmem:[#allocation5 + $0xf0] sm:$0xff]  ;;  %v945_v30 = vld [vmem:[#allocation5 + $0xe0] sm:$0xff]  ;;  %vm177_vm2 = vcmp.lt.s32.totalorder %v915_v8, 113 }
  0x1f   :  { %219 = vrot.lane.b32.xlu1 %v846_v2, %s786_s0  ;;  %215 = vrot.lane.b32.xlu0 %v848_v3, %s786_s0  ;;  %v960_v43 = vld [vmem:[#allocation5 + $0xd8] sm:$0xff]  ;;  %v962_v44 = vld [vmem:[#allocation5 + $0xc8] sm:$0xff]  ;;  %v964_v45 = vld [vmem:[#allocation5 + $0xd0] sm:$0xff]  ;;  %vm155_vm3 = vcmp.lt.s32.totalorder %v915_v8, 127  ;;  %vm133_vm4 = vcmp.lt.s32.totalorder %v915_v8, 1  ;;  %vm111_vm5 = vcmp.lt.s32.totalorder %v915_v8, 15 }
  0x20   :  { %v966_v46 = vld [vmem:[#allocation5 + $0xc0] sm:$0xff]  ;;  %v981_v59 = vld [vmem:[#allocation5 + $0xb8] sm:$0xff]  ;;  %v983_v60 = vld [vmem:[#allocation5 + $0xa8] sm:$0xff]  ;;  %vm89_vm6 = vcmp.lt.s32.totalorder %v915_v8, 16  ;;  %vm68_vm7 = vcmp.lt.s32.totalorder %v915_v8, 17 }
  0x21   :  { %v985_v61 = vld [vmem:[#allocation5 + $0xb0] sm:$0xff]  ;;  %v987_v62 = vld [vmem:[#allocation5 + $0xa0] sm:$0xff] }
  0x23   :  { %193 = vrot.lane.b32.xlu1 %v848_v3, %s787_s5  ;;  %191 = vrot.lane.b32.xlu0 %v840_v1, %s787_s5 }
  0x27   :  { %197 = vrot.lane.b32.xlu1 %v846_v2, %s787_s5  ;;  %195 = vrot.lane.b32.xlu0 %v838_v0, %s787_s5 }
  0x2b   :  { %171 = vrot.lane.b32.xlu1 %v848_v3, %s788_s9  ;;  %169 = vrot.lane.b32.xlu0 %v840_v1, %s788_s9 }
  0x2f   :  { %175 = vrot.lane.b32.xlu1 %v846_v2, %s788_s9  ;;  %173 = vrot.lane.b32.xlu0 %v838_v0, %s788_s9 }
  0x33   :  { %149 = vrot.lane.b32.xlu1 %v848_v3, %s789_s10  ;;  %147 = vrot.lane.b32.xlu0 %v840_v1, %s789_s10 }
  0x37   :  { %153 = vrot.lane.b32.xlu1 %v846_v2, %s789_s10  ;;  %151 = vrot.lane.b32.xlu0 %v838_v0, %s789_s10 }
  0x3b   :  { %127 = vrot.lane.b32.xlu1 %v848_v3, %s790_s11  ;;  %125 = vrot.lane.b32.xlu0 %v840_v1, %s790_s11 }
  0x3f   :  { %131 = vrot.lane.b32.xlu1 %v846_v2, %s790_s11  ;;  %129 = vrot.lane.b32.xlu0 %v838_v0, %s790_s11 }
  0x43   :  { %105 = vrot.lane.b32.xlu1 %v848_v3, %s791_s12  ;;  %103 = vrot.lane.b32.xlu0 %v840_v1, %s791_s12 }
  0x47   :  { %109 = vrot.lane.b32.xlu1 %v846_v2, %s791_s12  ;;  %107 = vrot.lane.b32.xlu0 %v838_v0, %s791_s12 }
  0x4b   :  { %83 = vrot.lane.b32.xlu1 %v848_v3, %s792_s13  ;;  %81 = vrot.lane.b32.xlu0 %v840_v1, %s792_s13 }
  0x4f   :  { %87 = vrot.lane.b32.xlu1 %v846_v2, %s792_s13  ;;  %85 = vrot.lane.b32.xlu0 %v838_v0, %s792_s13 }
  0x53   :  { %60 = vrot.lane.b32.xlu1 %v848_v3, %s795_s14  ;;  %58 = vrot.lane.b32.xlu0 %v840_v1, %s795_s14 }
  0x57   :  { %64 = vrot.lane.b32.xlu1 %v846_v2, %s795_s14  ;;  %62 = vrot.lane.b32.xlu0 %v838_v0, %s795_s14 }
  0x5b   :  { %237 = vperm.xlu0 %715, %v56_v6  }
  0x8d   :  { %v218_v9 = vpop.permute.xlu1 %217  ;;  %v214_v10 = vpop.permute.xlu0 %213 }
  0x91   :  { %v220_v15 = vpop.permute.xlu1 %219  ;;  %v216_v16 = vpop.permute.xlu0 %215 }
  0x92   :  { %v222_v17 = vsel %vm221_vm0, %v218_v9, %v220_v15  ;;  %v224_v18 = vsel %vm221_vm0, %v214_v10, %v216_v16  ;;  %v223_v19 = vsel %vm221_vm0, %v216_v16, %v218_v9  ;;  %v225_v20 = vsel %vm221_vm0, %v220_v15, %v214_v10 }
  0x93   :  { %v232_v21 = vmul.f32 %v918_v11, %v223_v19  ;;  %v234_v22 = vmul.f32 %v920_v12, %v225_v20  ;;  %v231_v23 = vmul.f32 %v922_v13, %v224_v18  ;;  %v233_v24 = vmul.f32 %v924_v14, %v222_v17  ;;  %v1002_v19 = vld [vmem:[#allocation5 + $0x68] sm:$0xff] }
  0x95   :  { %v194_v25 = vpop.permute.xlu1 %193  ;;  %258 = vmatprep.subr.mxu0 %v232_v21  ;;  %329 = vmatprep.subr.mxu1 %v234_v22  ;;  %v192_v26 = vpop.permute.xlu0 %191 }
  0x96   :  { %259 = vmatpush1.msra.mxu0 %v231_v23  ;;  %330 = vmatpush1.msra.mxu1 %v233_v24  ;;  %v202_v31 = vsel %vm199_vm1, %v192_v26, %v194_v25  ;;  %v1010_v24 = vld [vmem:[#allocation5 + $0x60] sm:$0xff] }
  0x97   :  { %v209_v40 = vmul.f32 %v945_v30, %v202_v31 }
  0x99   :  { %v198_v32 = vpop.permute.xlu1 %197  ;;  %v196_v33 = vpop.permute.xlu0 %195 }
  0x9a   :  { %v203_v34 = vsel %vm199_vm1, %v198_v32, %v192_v26  ;;  %v200_v35 = vsel %vm199_vm1, %v196_v33, %v198_v32  ;;  %v201_v36 = vsel %vm199_vm1, %v194_v25, %v196_v33  ;;  %v1012_v25 = vld [vmem:[#allocation5 + $0x70] sm:$0xff]  ;;  %v1014_v26 = vld [vmem:[#allocation5 + $0x78] sm:$0xff] }
  0x9b   :  { %v212_v37 = vmul.f32 %v939_v27, %v203_v34  ;;  %v210_v38 = vmul.f32 %v941_v28, %v201_v36  ;;  %v211_v39 = vmul.f32 %v943_v29, %v200_v35 }
  0x9d   :  { %v172_v41 = vpop.permute.xlu1 %171  ;;  %260 = vmatprep.subr.mxu0 %v210_v38  ;;  %331 = vmatprep.subr.mxu1 %v212_v37  ;;  %v170_v42 = vpop.permute.xlu0 %169 }
  0x9e   :  { %261 = vmatpush1.msra.mxu0 %v209_v40  ;;  %332 = vmatpush1.msra.mxu1 %v211_v39  ;;  %v180_v47 = vsel %vm177_vm2, %v170_v42, %v172_v41  ;;  %v1027_v39 = vld [vmem:[#allocation5 + $0x48] sm:$0xff] }
  0x9f   :  { %v187_v56 = vmul.f32 %v966_v46, %v180_v47 }
  0xa1   :  { %v176_v48 = vpop.permute.xlu1 %175  ;;  %v174_v49 = vpop.permute.xlu0 %173 }
  0xa2   :  { %v181_v50 = vsel %vm177_vm2, %v176_v48, %v170_v42  ;;  %v178_v51 = vsel %vm177_vm2, %v174_v49, %v176_v48  ;;  %v179_v52 = vsel %vm177_vm2, %v172_v41, %v174_v49  ;;  %v1032_v48 = vld [vmem:[#allocation5 + $0x40] sm:$0xff]  ;;  %v1034_v49 = vld [vmem:[#allocation5 + $0x50] sm:$0xff] }
  0xa3   :  { %v190_v53 = vmul.f32 %v960_v43, %v181_v50  ;;  %v188_v54 = vmul.f32 %v962_v44, %v179_v52  ;;  %v189_v55 = vmul.f32 %v964_v45, %v178_v51  ;;  %v1036_v50 = vld [vmem:[#allocation5 + $0x58] sm:$0xff] }
  0xa5   :  { %v150_v57 = vpop.permute.xlu1 %149  ;;  %262 = vmatprep.subr.mxu0 %v188_v54  ;;  %333 = vmatprep.subr.mxu1 %v190_v53  ;;  %v148_v58 = vpop.permute.xlu0 %147 }
  0xa6   :  { %263 = vmatpush1.msra.mxu0 %v187_v56  ;;  %334 = vmatpush1.msra.mxu1 %v189_v55  ;;  %v158_v63 = vsel %vm155_vm3, %v148_v58, %v150_v57 }
  0xa7   :  { %v165_v18 = vmul.f32 %v987_v62, %v158_v63  ;;  %v1048_v63 = vld [vmem:[#allocation5 + $0x28] sm:$0xff] }
  0xa9   :  { %v154_v5 = vpop.permute.xlu1 %153  ;;  %v152_v6 = vpop.permute.xlu0 %151 }
  0xaa   :  { %v159_v7 = vsel %vm155_vm3, %v154_v5, %v148_v58  ;;  %v156_v9 = vsel %vm155_vm3, %v152_v6, %v154_v5  ;;  %v157_v10 = vsel %vm155_vm3, %v150_v57, %v152_v6 }
  0xab   :  { %v168_v15 = vmul.f32 %v981_v59, %v159_v7  ;;  %v166_v16 = vmul.f32 %v983_v60, %v157_v10  ;;  %v167_v17 = vmul.f32 %v985_v61, %v156_v9  ;;  %v1053_v10 = vld [vmem:[#allocation5 + $0x20] sm:$0xff] }
  0xad   :  { %v128_v20 = vpop.permute.xlu1 %127  ;;  %264 = vmatprep.subr.mxu0 %v166_v16  ;;  %335 = vmatprep.subr.mxu1 %v168_v15  ;;  %v126_v21 = vpop.permute.xlu0 %125  ;;  %v1055_v15 = vld [vmem:[#allocation5 + $0x30] sm:$0xff]  ;;  %v1057_v16 = vld [vmem:[#allocation5 + $0x38] sm:$0xff] }
  0xae   :  { %v136_v22 = vsel %vm133_vm4, %v126_v21, %v128_v20  ;;  %265 = vmatpush1.msra.mxu0 %v165_v18  ;;  %336 = vmatpush1.msra.mxu1 %v167_v17 }
  0xaf   :  { %v144_v23 = vmul.f32 %v1002_v19, %v136_v22  ;;  %266 = vmatprep.subr.mxu0 %v848_v3  ;;  %337 = vmatprep.subr.mxu1 %v846_v2 }
  0xb0   :  { %267 = vmatpush1.msra.mxu0 %v840_v1  ;;  %338 = vmatpush1.msra.mxu1 %v838_v0 }
  0xb1   :  { %v132_v31 = vpop.permute.xlu1 %131  ;;  %268 = vmatprep.subr.mxu0 %v144_v23  ;;  %v130_v32 = vpop.permute.xlu0 %129 }
  0xb2   :  { %v137_v33 = vsel %vm133_vm4, %v132_v31, %v126_v21  ;;  %v134_v34 = vsel %vm133_vm4, %v130_v32, %v132_v31  ;;  %v135_v35 = vsel %vm133_vm4, %v128_v20, %v130_v32 }
  0xb3   :  { %v143_v36 = vmul.f32 %v1010_v24, %v137_v33  ;;  %v145_v37 = vmul.f32 %v1012_v25, %v135_v35  ;;  %v146_v38 = vmul.f32 %v1014_v26, %v134_v34  ;;  %v1069_v33 = vld [vmem:[#allocation5 + $0x8] sm:$0xff] }
  0xb5   :  { %v106_v40 = vpop.permute.xlu1 %105  ;;  %269 = vmatpush1.msra.mxu0 %v143_v36  ;;  %339 = vmatprep.subr.mxu1 %v146_v38  ;;  %v104_v41 = vpop.permute.xlu0 %103  ;;  %v1074_v38 = vld [vmem:[#allocation5] sm:$0xff] }
  0xb6   :  { %v114_v42 = vsel %vm111_vm5, %v104_v41, %v106_v40  ;;  %340 = vmatpush1.msra.mxu1 %v145_v37 }
  0xb7   :  { %v122_v47 = vmul.f32 %v1027_v39, %v114_v42 }
  0xb9   :  { %v110_v51 = vpop.permute.xlu1 %109  ;;  %270 = vmatprep.subr.mxu0 %v122_v47  ;;  %v108_v52 = vpop.permute.xlu0 %107 }
  0xba   :  { %v115_v53 = vsel %vm111_vm5, %v110_v51, %v104_v41  ;;  %v112_v54 = vsel %vm111_vm5, %v108_v52, %v110_v51  ;;  %v113_v55 = vsel %vm111_vm5, %v106_v40, %v108_v52  ;;  %v1076_v40 = vld [vmem:[#allocation5 + $0x10] sm:$0xff]  ;;  %v1078_v41 = vld [vmem:[#allocation5 + $0x18] sm:$0xff] }
  0xbb   :  { %v121_v56 = vmul.f32 %v1032_v48, %v115_v53  ;;  %v123_v57 = vmul.f32 %v1034_v49, %v113_v55  ;;  %v124_v58 = vmul.f32 %v1036_v50, %v112_v54 }
  0xbd   :  { %v84_v5 = vpop.permute.xlu1 %83  ;;  %271 = vmatpush1.msra.mxu0 %v121_v56  ;;  %341 = vmatprep.subr.mxu1 %v124_v58  ;;  %v82_v6 = vpop.permute.xlu0 %81 }
  0xbe   :  { %v92_v7 = vsel %vm89_vm6, %v82_v6, %v84_v5  ;;  %342 = vmatpush1.msra.mxu1 %v123_v57  ;;  %v54_v57 = vld [vmem:[%s1284_s1] sm:$0xff] }
  0xbf   :  { %v100_v9 = vmul.f32 %v1048_v63, %v92_v7 }
  0xc1   :  { %v88_v17 = vpop.permute.xlu1 %87  ;;  %272 = vmatprep.subr.mxu0 %v100_v9  ;;  %v86_v18 = vpop.permute.xlu0 %85 }
  0xc2   :  { %v93_v20 = vsel %vm89_vm6, %v88_v17, %v82_v6  ;;  %v90_v21 = vsel %vm89_vm6, %v86_v18, %v88_v17  ;;  %v91_v22 = vsel %vm89_vm6, %v84_v5, %v86_v18 }
  0xc3   :  { %v99_v23 = vmul.f32 %v1053_v10, %v93_v20  ;;  %v101_v31 = vmul.f32 %v1055_v15, %v91_v22  ;;  %v102_v32 = vmul.f32 %v1057_v16, %v90_v21 }
  0xc5   :  { %v61_v34 = vpop.permute.xlu1 %60  ;;  %273 = vmatpush1.msra.mxu0 %v99_v23  ;;  %343 = vmatprep.subr.mxu1 %v102_v32  ;;  %v59_v35 = vpop.permute.xlu0 %58  ;;  %v57_v32 = vld [vmem:[%s1287_s4] sm:$0xff] }
  0xc6   :  { %v71_v36 = vsel %vm68_vm7, %v59_v35, %v61_v34  ;;  %344 = vmatpush1.msra.mxu1 %v101_v31 }
  0xc7   :  { %v78_v37 = vmul.f32 %v1069_v33, %v71_v36 }
  0xc9   :  { %v65_v42 = vpop.permute.xlu1 %64  ;;  %274 = vmatprep.subr.mxu0 %v78_v37  ;;  %v63_v47 = vpop.permute.xlu0 %62 }
  0xca   :  { %v72_v51 = vsel %vm68_vm7, %v65_v42, %v59_v35  ;;  %v69_v52 = vsel %vm68_vm7, %v63_v47, %v65_v42  ;;  %v70_v53 = vsel %vm68_vm7, %v61_v34, %v63_v47 }
  0xcb   :  { %v77_v54 = vmul.f32 %v1074_v38, %v72_v51  ;;  %v79_v55 = vmul.f32 %v1076_v40, %v70_v53  ;;  %v80_v56 = vmul.f32 %v1078_v41, %v69_v52 }
  0xcd   :  { %275 = vmatpush1.msra.mxu0 %v77_v54  ;;  %345 = vmatprep.subr.mxu1 %v80_v56 }
  0xce   :  { %696 = vmatmul.mubr.msk.f32.vlgmr.msra.gmra.mxu0 %vm240_vm8, %v54_v57  ;;  %346 = vmatpush1.msra.mxu1 %v79_v55 }
  0xcf   :  { %697 = vmatmul.mubr.msk.f32.vlgmr.msra.gmra.mxu1 %vm240_vm8, %v54_v57  ;;  %590 = vmatprep.mubr.f32.mxu0 %v793_v4 }
  0xd0   :  { %661 = vmatprep.mubr.f32.mxu1 %v793_v4 }
  0xd6   :  { %v238_v58 = vpop.permute.xlu0 %237 }
 0x18e   :  { %v310_v5 = vpop.f32.mrf.mxu0 }
 0x18f   :  { %v311_v6 = vadd.f32 %v310_v5, %v238_v58  ;;  %v381_v7 = vpop.f32.mrf.mxu1 }
 0x190   :  { %v382_v9 = vadd.f32 %v381_v7, %v238_v58  ;;  %v312_v17 = vpop.f32.mrf.mxu0 }
 0x191   :  { %v1096_v18 = vmax.f32 %v311_v6, 0.0  ;;  %v313_v20 = vadd.f32 %v312_v17, %v238_v58  ;;  %v383_v22 = vpop.f32.mrf.mxu1 }
 0x192   :  { %v1098_v21 = vmax.f32 %v382_v9, 0.0  ;;  %v384_v4 = vadd.f32 %v383_v22, %v238_v58 }
 0x193   :  { %502 = vrot.lane.b32.xlu1 %v1096_v18, %s786_s0  ;;  %v1104_v23 = vmax.f32 %v313_v20, 0.0 }
 0x194   :  { %506 = vrot.lane.b32.xlu0 %v1098_v21, %s786_s0  ;;  %v1110_v31 = vmax.f32 %v384_v4, 0.0 }
 0x197   :  { %504 = vrot.lane.b32.xlu1 %v1104_v23, %s786_s0 }
 0x198   :  { %486 = vrot.lane.b32.xlu0 %v1096_v18, %s787_s5 }
 0x19b   :  { %508 = vrot.lane.b32.xlu1 %v1110_v31, %s786_s0 }
 0x19c   :  { %490 = vrot.lane.b32.xlu0 %v1098_v21, %s787_s5 }
 0x19f   :  { %488 = vrot.lane.b32.xlu1 %v1104_v23, %s787_s5 }
 0x1a0   :  { %470 = vrot.lane.b32.xlu0 %v1096_v18, %s788_s9 }
 0x1a3   :  { %492 = vrot.lane.b32.xlu1 %v1110_v31, %s787_s5 }
 0x1a4   :  { %474 = vrot.lane.b32.xlu0 %v1098_v21, %s788_s9 }
 0x1a7   :  { %472 = vrot.lane.b32.xlu1 %v1104_v23, %s788_s9 }
 0x1a8   :  { %454 = vrot.lane.b32.xlu0 %v1096_v18, %s789_s10 }
 0x1ab   :  { %476 = vrot.lane.b32.xlu1 %v1110_v31, %s788_s9 }
 0x1ac   :  { %458 = vrot.lane.b32.xlu0 %v1098_v21, %s789_s10 }
 0x1af   :  { %456 = vrot.lane.b32.xlu1 %v1104_v23, %s789_s10 }
 0x1b0   :  { %438 = vrot.lane.b32.xlu0 %v1096_v18, %s790_s11 }
 0x1b3   :  { %460 = vrot.lane.b32.xlu1 %v1110_v31, %s789_s10 }
 0x1b4   :  { %442 = vrot.lane.b32.xlu0 %v1098_v21, %s790_s11 }
 0x1b7   :  { %440 = vrot.lane.b32.xlu1 %v1104_v23, %s790_s11 }
 0x1b8   :  { %422 = vrot.lane.b32.xlu0 %v1096_v18, %s791_s12 }
 0x1bb   :  { %444 = vrot.lane.b32.xlu1 %v1110_v31, %s790_s11 }
 0x1bc   :  { %426 = vrot.lane.b32.xlu0 %v1098_v21, %s791_s12 }
 0x1bf   :  { %424 = vrot.lane.b32.xlu1 %v1104_v23, %s791_s12 }
 0x1c0   :  { %406 = vrot.lane.b32.xlu0 %v1096_v18, %s792_s13 }
 0x1c3   :  { %428 = vrot.lane.b32.xlu1 %v1110_v31, %s791_s12 }
 0x1c4   :  { %410 = vrot.lane.b32.xlu0 %v1098_v21, %s792_s13 }
 0x1c7   :  { %408 = vrot.lane.b32.xlu1 %v1104_v23, %s792_s13 }
 0x1c8   :  { %390 = vrot.lane.b32.xlu0 %v1096_v18, %s795_s14 }
 0x1cb   :  { %412 = vrot.lane.b32.xlu1 %v1110_v31, %s792_s13 }
 0x1cc   :  { %394 = vrot.lane.b32.xlu0 %v1098_v21, %s795_s14 }
 0x1cf   :  { %392 = vrot.lane.b32.xlu1 %v1104_v23, %s795_s14 }
 0x1d0   :  { %520 = vperm.xlu0 %715, %v57_v32  }
 0x1d3   :  { %396 = vrot.lane.b32.xlu1 %v1110_v31, %s795_s14 }
 0x205   :  { %v503_v34 = vpop.permute.xlu1 %502 }
 0x206   :  { %v507_v35 = vpop.permute.xlu0 %506 }
 0x209   :  { %v505_v36 = vpop.permute.xlu1 %504 }
 0x20a   :  { %v511_v37 = vsel %vm221_vm0, %v505_v36, %v507_v35  ;;  %v512_v42 = vsel %vm221_vm0, %v503_v34, %v505_v36  ;;  %v487_v47 = vpop.permute.xlu0 %486 }
 0x20b   :  { %v514_v51 = vmul.f32 %v512_v42, %v922_v13  ;;  %v515_v52 = vmul.f32 %v511_v37, %v918_v11 }
 0x20d   :  { %540 = vmatprep.subr.mxu0 %v515_v52  ;;  %v509_v53 = vpop.permute.xlu1 %508 }
 0x20e   :  { %v510_v54 = vsel %vm221_vm0, %v507_v35, %v509_v53  ;;  %v513_v55 = vsel %vm221_vm0, %v509_v53, %v503_v34  ;;  %v491_v56 = vpop.permute.xlu0 %490  ;;  %541 = vmatpush1.msra.mxu0 %v514_v51 }
 0x20f   :  { %v516_v57 = vmul.f32 %v510_v54, %v924_v14  ;;  %v517_v58 = vmul.f32 %v513_v55, %v920_v12 }
 0x211   :  { %611 = vmatprep.subr.mxu1 %v517_v58  ;;  %v489_v5 = vpop.permute.xlu1 %488 }
 0x212   :  { %v495_v13 = vsel %vm199_vm1, %v489_v5, %v491_v56  ;;  %v496_v11 = vsel %vm199_vm1, %v487_v47, %v489_v5  ;;  %v471_v6 = vpop.permute.xlu0 %470  ;;  %612 = vmatpush1.msra.mxu1 %v516_v57 }
 0x213   :  { %v498_v7 = vmul.f32 %v496_v11, %v945_v30  ;;  %v499_v9 = vmul.f32 %v495_v13, %v941_v28 }
 0x215   :  { %542 = vmatprep.subr.mxu0 %v499_v9  ;;  %v493_v17 = vpop.permute.xlu1 %492 }
 0x216   :  { %v494_v14 = vsel %vm199_vm1, %v491_v56, %v493_v17  ;;  %v497_v12 = vsel %vm199_vm1, %v493_v17, %v487_v47  ;;  %v475_v20 = vpop.permute.xlu0 %474  ;;  %543 = vmatpush1.msra.mxu0 %v498_v7 }
 0x217   :  { %v500_v22 = vmul.f32 %v494_v14, %v943_v29  ;;  %v501_v4 = vmul.f32 %v497_v12, %v939_v27 }
 0x219   :  { %613 = vmatprep.subr.mxu1 %v501_v4  ;;  %v473_v32 = vpop.permute.xlu1 %472 }
 0x21a   :  { %v479_v30 = vsel %vm177_vm2, %v473_v32, %v475_v20  ;;  %v480_v28 = vsel %vm177_vm2, %v471_v6, %v473_v32  ;;  %v455_v34 = vpop.permute.xlu0 %454  ;;  %614 = vmatpush1.msra.mxu1 %v500_v22 }
 0x21b   :  { %v482_v35 = vmul.f32 %v480_v28, %v966_v46  ;;  %v483_v36 = vmul.f32 %v479_v30, %v962_v44 }
 0x21d   :  { %544 = vmatprep.subr.mxu0 %v483_v36  ;;  %v477_v37 = vpop.permute.xlu1 %476 }
 0x21e   :  { %v478_v29 = vsel %vm177_vm2, %v475_v20, %v477_v37  ;;  %v481_v27 = vsel %vm177_vm2, %v477_v37, %v471_v6  ;;  %v459_v42 = vpop.permute.xlu0 %458  ;;  %545 = vmatpush1.msra.mxu0 %v482_v35 }
 0x21f   :  { %v484_v47 = vmul.f32 %v478_v29, %v964_v45  ;;  %v485_v51 = vmul.f32 %v481_v27, %v960_v43 }
 0x221   :  { %615 = vmatprep.subr.mxu1 %v485_v51  ;;  %v457_v52 = vpop.permute.xlu1 %456 }
 0x222   :  { %v463_v46 = vsel %vm155_vm3, %v457_v52, %v459_v42  ;;  %v464_v44 = vsel %vm155_vm3, %v455_v34, %v457_v52  ;;  %v439_v53 = vpop.permute.xlu0 %438  ;;  %616 = vmatpush1.msra.mxu1 %v484_v47 }
 0x223   :  { %v466_v54 = vmul.f32 %v464_v44, %v987_v62  ;;  %v467_v55 = vmul.f32 %v463_v46, %v983_v60 }
 0x225   :  { %546 = vmatprep.subr.mxu0 %v467_v55  ;;  %v461_v56 = vpop.permute.xlu1 %460 }
 0x226   :  { %v462_v45 = vsel %vm155_vm3, %v459_v42, %v461_v56  ;;  %v465_v43 = vsel %vm155_vm3, %v461_v56, %v455_v34  ;;  %v443_v57 = vpop.permute.xlu0 %442  ;;  %547 = vmatpush1.msra.mxu0 %v466_v54 }
 0x227   :  { %v468_v58 = vmul.f32 %v462_v45, %v985_v61  ;;  %v469_v5 = vmul.f32 %v465_v43, %v981_v59  ;;  %548 = vmatprep.subr.mxu0 %v1104_v23 }
 0x228   :  { %549 = vmatpush1.msra.mxu0 %v1096_v18 }
 0x229   :  { %617 = vmatprep.subr.mxu1 %v469_v5  ;;  %v441_v60 = vpop.permute.xlu1 %440 }
 0x22a   :  { %v448_v62 = vsel %vm133_vm4, %v439_v53, %v441_v60  ;;  %v423_v13 = vpop.permute.xlu0 %422  ;;  %618 = vmatpush1.msra.mxu1 %v468_v58  ;;  %v447_v59 = vsel %vm133_vm4, %v441_v60, %v443_v57 }
 0x22b   :  { %v451_v11 = vmul.f32 %v448_v62, %v1002_v19  ;;  %619 = vmatprep.subr.mxu1 %v1110_v31  ;;  %v452_v31 = vmul.f32 %v447_v59, %v1012_v25 }
 0x22c   :  { %620 = vmatpush1.msra.mxu1 %v1098_v21 }
 0x22d   :  { %550 = vmatprep.subr.mxu0 %v451_v11  ;;  %v445_v61 = vpop.permute.xlu1 %444 }
 0x22e   :  { %v446_v18 = vsel %vm133_vm4, %v443_v57, %v445_v61  ;;  %v449_v23 = vsel %vm133_vm4, %v445_v61, %v439_v53  ;;  %v427_v6 = vpop.permute.xlu0 %426 }
 0x22f   :  { %v450_v7 = vmul.f32 %v449_v23, %v1010_v24  ;;  %v453_v19 = vmul.f32 %v446_v18, %v1014_v26 }
 0x231   :  { %551 = vmatpush1.msra.mxu0 %v450_v7  ;;  %621 = vmatprep.subr.mxu1 %v453_v19  ;;  %v425_v21 = vpop.permute.xlu1 %424 }
 0x232   :  { %v432_v9 = vsel %vm111_vm5, %v423_v13, %v425_v21  ;;  %v407_v17 = vpop.permute.xlu0 %406  ;;  %622 = vmatpush1.msra.mxu1 %v452_v31  ;;  %v431_v12 = vsel %vm111_vm5, %v425_v21, %v427_v6 }
 0x233   :  { %v435_v14 = vmul.f32 %v432_v9, %v1027_v39  ;;  %v436_v4 = vmul.f32 %v431_v12, %v1034_v49 }
 0x235   :  { %552 = vmatprep.subr.mxu0 %v435_v14  ;;  %v429_v20 = vpop.permute.xlu1 %428 }
 0x236   :  { %v430_v24 = vsel %vm111_vm5, %v427_v6, %v429_v20  ;;  %v433_v25 = vsel %vm111_vm5, %v429_v20, %v423_v13  ;;  %v411_v32 = vpop.permute.xlu0 %410 }
 0x237   :  { %v434_v26 = vmul.f32 %v433_v25, %v1032_v48  ;;  %v437_v22 = vmul.f32 %v430_v24, %v1036_v50 }
 0x239   :  { %553 = vmatpush1.msra.mxu0 %v434_v26  ;;  %623 = vmatprep.subr.mxu1 %v437_v22  ;;  %v409_v39 = vpop.permute.xlu1 %408 }
 0x23a   :  { %v416_v30 = vsel %vm89_vm6, %v407_v17, %v409_v39  ;;  %624 = vmatpush1.msra.mxu1 %v436_v4  ;;  %v415_v34 = vsel %vm89_vm6, %v409_v39, %v411_v32  ;;  %v391_v48 = vpop.permute.xlu0 %390 }
 0x23b   :  { %v419_v28 = vmul.f32 %v416_v30, %v1048_v63  ;;  %v420_v29 = vmul.f32 %v415_v34, %v1055_v15 }
 0x23d   :  { %554 = vmatprep.subr.mxu0 %v419_v28  ;;  %v413_v35 = vpop.permute.xlu1 %412 }
 0x23e   :  { %v414_v50 = vsel %vm89_vm6, %v411_v32, %v413_v35  ;;  %v417_v49 = vsel %vm89_vm6, %v413_v35, %v407_v17  ;;  %v395_v47 = vpop.permute.xlu0 %394 }
 0x23f   :  { %v418_v36 = vmul.f32 %v417_v49, %v1053_v10  ;;  %v421_v37 = vmul.f32 %v414_v50, %v1057_v16 }
 0x241   :  { %555 = vmatpush1.msra.mxu0 %v418_v36  ;;  %625 = vmatprep.subr.mxu1 %v421_v37  ;;  %v393_v63 = vpop.permute.xlu1 %392 }
 0x242   :  { %v400_v27 = vsel %vm68_vm7, %v391_v48, %v393_v63  ;;  %626 = vmatpush1.msra.mxu1 %v420_v29  ;;  %v399_v51 = vsel %vm68_vm7, %v393_v63, %v395_v47 }
 0x243   :  { %v403_v42 = vmul.f32 %v400_v27, %v1069_v33  ;;  %v55_v33 = vld [vmem:[%s1286_s3] sm:$0xff]  ;;  %v404_v44 = vmul.f32 %v399_v51, %v1076_v40  ;;  %s796_s3 = smov [#allocation7]  }
 0x244   :  { %s686_s20 = sshll.u32 %s796_s3, 4  ;;  %s687_s20 = int_to_ptr.vmem [resolvable:$true] %s686_s20 }
 0x245   :  { %556 = vmatprep.subr.mxu0 %v403_v42  ;;  %v397_v52 = vpop.permute.xlu1 %396  ;;  %s756_s21 = scalar_lea.vmem %s687_s20, 512  ;;  %p761_p11 = scmp.lt.s32.totalorder %s687_s20, %s687_s20 }
 0x246   :  { %v398_v10 = vsel %vm68_vm7, %v395_v47, %v397_v52  ;;  %v401_v15 = vsel %vm68_vm7, %v397_v52, %v391_v48  ;;  %p757_p10 = scmp.ne.s32.totalorder %s687_s20, %s756_s21  ;;  %p762_p12 = scmp.lt.s32.totalorder %s756_s21, %s756_s21 }
 0x247   :  { %v402_v16 = vmul.f32 %v401_v15, %v1074_v38  ;;  %v405_v46 = vmul.f32 %v398_v10, %v1078_v41 }
 0x248   :  { %p763_p13 = por %p762_p12, %p761_p11 }
 0x249   :  { %557 = vmatpush1.msra.mxu0 %v402_v16  ;;  %627 = vmatprep.subr.mxu1 %v405_v46 }
 0x24a   :  { %698 = vmatmul.mubr.msk.f32.vlgmr.msra.gmra.mxu0 %vm240_vm8, %v55_v33  ;;  %628 = vmatpush1.msra.mxu1 %v404_v44  ;;  %p764_p0 = pnand %p763_p13, %p757_p10 }
 0x24b   :  { %699 = vmatmul.mubr.msk.f32.vlgmr.msra.gmra.mxu1 %vm240_vm8, %v55_v33  ;;  %v521_v53 = vpop.permute.xlu0 %520 }
 0x30a   :  { %v592_v8 = vpop.f32.mrf.mxu0 }
 0x30b   :  { %v593_v54 = vadd.f32 %v592_v8, %v521_v53  ;;  %v663_v55 = vpop.f32.mrf.mxu1 }
 0x30c   :  { %v664_v38 = vadd.f32 %v663_v55, %v521_v53  ;;  %v594_v56 = vpop.f32.mrf.mxu0 }
 0x30d   :  { %v668_v41 = vadd.f32 %v593_v54, %v840_v1  ;;  %v595_v45 = vadd.f32 %v594_v56, %v521_v53  ;;  %v665_v43 = vpop.f32.mrf.mxu1 }
 0x30e   :  { %v670_v57 = vadd.f32 %v664_v38, %v838_v0  ;;  %v666_v40 = vadd.f32 %v665_v43, %v521_v53 }
 0x30f   :  { %v672_v58 = vmax.f32 %v668_v41, 0.0  ;;  %v669_v5 = vadd.f32 %v595_v45, %v848_v3 }
 0x310   :  { %v674_v60 = vmax.f32 %v670_v57, 0.0  ;;  %v671_v62 = vadd.f32 %v666_v40, %v846_v2 }
 0x311   :  { %676 = vst [vmem:[#allocation7] sm:$0xff] %v672_v58  ;;  %v673_v13 = vmax.f32 %v669_v5, 0.0 }
 0x312   :  { %678 = vst [vmem:[#allocation7 + $0x10] sm:$0xff] %v674_v60  ;;  %v675_v11 = vmax.f32 %v671_v62, 0.0 }
 0x313   :  { %677 = vst [vmem:[#allocation7 + $0x8] sm:$0xff] %v673_v13 }
 0x314   :  { %679 = vst [vmem:[#allocation7 + $0x18] sm:$0xff] %v675_v11 }
 0x315   :  { %767 = shalt.err (!%p764_p0)
}
 0x316   :  { %689 = dma.vmem_to_hbm [thread:$0]  %s687_s20, 512, %s1289_s6, [#allocation4]  }
 0x317   :  { %780 = dma.done.wait [#allocation4], 512  }
 0x318   :  { %781 = vsyncadd [#allocation4], 4294966784 }
 0x319   :  { %693 = vsyncpa [#allocation3], 1 }
 0x31a   :  { %694 = vsyncpa [#allocation6], 1 }
 0x31b   :  { %695 = vsyncpa [#allocation4], 1 }

</bundles_post_ra>
